<compile_context>
chip_gen: v7x
topology: tpu7x:2x2x1
jax: 0.10.0
libtpu: 0.0.40
codegen_flags: <defaults>
</compile_context>

<pallas_src>
import functools
import math

import jax
import jax.numpy as jnp
from jax.experimental import pallas as pl
from jax.experimental.pallas import tpu as pltpu

ALPHA = 0.25
GAMMA = 2.0  # module default; specialized as a square in the kernel

LANE = 128
MAX_TILE_ROWS = 4096   # (4096,128) f32: 2 inputs x 2 bufs x 2 MiB + 2 MiB acc ~= 10 MiB VMEM


def _round_up(x, m):
    return (x + m - 1) // m * m


def _num_parallel_cores():
    """2 on chips with two TensorCores addressable via a 'parallel' grid axis (v7x), else 1."""
    try:
        kind = jax.devices()[0].device_kind.lower()
    except Exception:
        return 1
    return 2 if "7" in kind else 1


def _elem_loss(p, t):
    """Binary-target focal loss, one transcendental per element.

    p_t = (t==1 ? p : 1-p), bce = -clamp(log p_t, -100), pt == p_t (up to the clamp),
    gamma == 2 is a square, and the alpha select shares the (t == 1) predicate.
    """
    is_pos = t == 1.0
    base = jnp.where(is_pos, p, 1.0 - p)                 # p_t
    bce = -jnp.maximum(jnp.log(base), -100.0)            # PyTorch BCE log clamp at -100
    one_minus_pt = 1.0 - base
    alpha_w = jnp.where(is_pos, 1.0 - ALPHA, ALPHA)      # 0.75 if t==1 else 0.25
    return alpha_w * (one_minus_pt * one_minus_pt) * bce


def _focal_loss_kernel(p_ref, t_ref, out_ref, acc_ref, *,
                       rows, tile_rows, tiles_per_core, needs_edge):
    c = pl.program_id(0)   # "parallel" core-split axis
    i = pl.program_id(1)   # "arbitrary" reduction axis

    @pl.when(i == 0)
    def _init():
        acc_ref[...] = jnp.zeros_like(acc_ref)

    p = p_ref[...].astype(jnp.float32)
    t = t_ref[...].astype(jnp.float32)

    if needs_edge:
        lin = c * tiles_per_core + i
        tile_start = lin * tile_rows
        is_full = tile_start + tile_rows <= rows          # fully in-bounds tile

        @pl.when(is_full)
        def _full_tile():
            # Hot path: mask-free, VALU-only accumulate.
            acc_ref[...] += _elem_loss(p, t)

        # Ragged final tile only: mask rows past the true extent.  Fully-out-of-range
        # duplicate tiles (clamped index_map) fail both conditions and are skipped.
        @pl.when(jnp.logical_and(jnp.logical_not(is_full), tile_start < rows))
        def _ragged_tile():
            row_ids = tile_start + jax.lax.broadcasted_iota(jnp.int32, p.shape, 0)
            acc_ref[...] += jnp.where(row_ids < rows, _elem_loss(p, t), 0.0)
    else:
        acc_ref[...] += _elem_loss(p, t)

    @pl.when(i == tiles_per_core - 1)
    def _finalize():
        # Single XLU reduce per core; (1, 128) lane partials go to HBM.
        out_ref[...] = jnp.sum(acc_ref[...], axis=0, keepdims=True)


def focal_loss2(inputs, targets):
    """FocalLoss2(alpha=0.25, gamma=2, use_logits=False, size_average=True).forward.

    `inputs` are probabilities in [0, 1]; `targets` must be binary {0, 1} but may be any
    dtype (bool/int8/bf16/f32) — narrower dtypes cut HBM traffic, the cast is in-kernel.
    """
    assert inputs.shape == targets.shape
    total = math.prod(inputs.shape)
    assert total > 0

    p_flat = inputs.reshape(-1)
    t_flat = targets.reshape(-1)

    # Lane-dense (rows, 128) view.  Zero padding contributes exactly zero loss
    # (t=0, p=0 -> p_t=1 -> bce=0 and (1-pt)^2=0) and we divide by the true element
    # count, so this copies only in the (rare) lane-unaligned case.
    padded_total = _round_up(total, LANE)
    if padded_total != total:
        p_flat = jnp.pad(p_flat, (0, padded_total - total))
        t_flat = jnp.pad(t_flat, (0, padded_total - total))
    rows = padded_total // LANE
    p2d = p_flat.reshape(rows, LANE)
    t2d = t_flat.reshape(rows, LANE)

    ncores = _num_parallel_cores()

    # Row-tile size: multiple of 8 (f32 sublane tile), never larger than the slab.
    if rows < 8:
        tile_rows = rows
    else:
        target = _round_up(pl.cdiv(rows, ncores), 8)
        tile_rows = min(MAX_TILE_ROWS, target, (rows // 8) * 8)
    tiles_total = pl.cdiv(rows, tile_rows)
    tiles_per_core = pl.cdiv(tiles_total, ncores)
    needs_clamp = ncores * tiles_per_core > tiles_total       # never issue a fully-OOB DMA
    needs_edge = ncores * tiles_per_core * tile_rows > rows   # ragged / duplicate tiles exist

    def row_block(c, i):
        lin = c * tiles_per_core + i
        if needs_clamp:
            lin = jnp.minimum(lin, tiles_total - 1)
        return (lin, 0)

    kernel = functools.partial(
        _focal_loss_kernel,
        rows=rows,
        tile_rows=tile_rows,
        tiles_per_core=tiles_per_core,
        needs_edge=needs_edge,
    )

    # Explicit VMEM budget: 2 inputs x 2 pipeline buffers x block + f32 accumulator + headroom.
    block_elems = tile_rows * LANE
    vmem_limit = (2 * block_elems * (p2d.dtype.itemsize + t2d.dtype.itemsize)
                  + 4 * block_elems
                  + (8 << 20))

    partials = pl.pallas_call(
        kernel,
        out_shape=jax.ShapeDtypeStruct((ncores, LANE), jnp.float32),
        grid_spec=pltpu.PrefetchScalarGridSpec(
            num_scalar_prefetch=0,
            grid=(ncores, tiles_per_core),
            in_specs=[
                pl.BlockSpec((tile_rows, LANE), row_block),
                pl.BlockSpec((tile_rows, LANE), row_block),
            ],
            out_specs=pl.BlockSpec((1, LANE), lambda c, i: (c, 0)),
            scratch_shapes=[pltpu.VMEM((tile_rows, LANE), jnp.float32)],
        ),
        compiler_params=pltpu.CompilerParams(
            dimension_semantics=("parallel", "arbitrary"),
            vmem_limit_bytes=int(vmem_limit),
        ),
    )(p2d, t2d)

    # size_average=True -> mean over all (unpadded) elements; tiny epilogue on <=2x128 floats.
    return jnp.sum(partials) / jnp.float32(total)


def _focal_loss_ref(inputs, targets, alpha=ALPHA, gamma=GAMMA):
    """Pure-JAX reference matching the PyTorch module exactly."""
    p = inputs.astype(jnp.float32)
    t = targets.astype(jnp.float32)
    log_p = jnp.maximum(jnp.log(p), -100.0)
    log_1mp = jnp.maximum(jnp.log(1.0 - p), -100.0)
    bce = -(t * log_p + (1.0 - t) * log_1mp)
    pt = jnp.exp(-bce)
    alpha_w = jnp.where(t == 0.0, alpha, 1.0 - alpha)
    f_loss = alpha_w * (1.0 - pt) ** gamma * bce
    return jnp.mean(f_loss)


if __name__ == "__main__":
    key = jax.random.PRNGKey(0)
    k1, k2, k3, k4, k5, k6 = jax.random.split(key, 6)

    # Main check: NCHW probabilities + binary f32 targets (module defaults).
    B, C, H, W = 2, 4, 16, 16
    inputs = jax.nn.sigmoid(jax.random.normal(k1, (B, C, H, W), jnp.float32))
    targets = jax.random.bernoulli(k2, 0.3, (B, C, H, W)).astype(jnp.float32)
    loss = focal_loss2(inputs, targets)
    jax.block_until_ready(loss)
    ref = _focal_loss_ref(inputs, targets)
    assert jnp.allclose(loss, ref, rtol=1e-5, atol=1e-6), (loss, ref)

    # Lane-unaligned shape: exercises the zero-pad path and the pl.when-gated ragged tile.
    shp2 = (3, 5, 7, 11)
    inputs2 = jax.nn.sigmoid(jax.random.normal(k3, shp2, jnp.float32))
    targets2 = jax.random.bernoulli(k4, 0.5, shp2).astype(jnp.float32)
    loss2 = focal_loss2(inputs2, targets2)
    jax.block_until_ready(loss2)
    ref2 = _focal_loss_ref(inputs2, targets2)
    assert jnp.allclose(loss2, ref2, rtol=1e-5, atol=1e-6), (loss2, ref2)

    # Narrow-dtype targets (int8): in-kernel cast, ~1.6x less HBM traffic for the target stream.
    shp3 = (2, 4, 64, 16)
    inputs3 = jax.nn.sigmoid(jax.random.normal(k5, shp3, jnp.float32))
    targets3 = jax.random.bernoulli(k6, 0.3, shp3).astype(jnp.int8)
    loss3 = focal_loss2(inputs3, targets3)
    jax.block_until_ready(loss3)
    ref3 = _focal_loss_ref(inputs3, targets3)
    assert jnp.allclose(loss3, ref3, rtol=1e-5, atol=1e-6), (loss3, ref3)

    print("KERNEL_OK")
</pallas_src>

<mosaic_0001>
module attributes {stable_mosaic.version = 11 : i64} {
  func.func @_focal_loss_kernel(%arg0: i32, %arg1: i32, %arg2: memref<16x128xf32, #tpu.memory_space<vmem>>, %arg3: memref<16x128xf32, #tpu.memory_space<vmem>>, %arg4: memref<1x128xf32, #tpu.memory_space<vmem>>, %arg5: memref<16x128xf32, #tpu.memory_space<vmem>>) attributes {dimension_semantics = [#tpu.dimension_semantics<parallel>, #tpu.dimension_semantics<arbitrary>], iteration_bounds = array<i64: 1, 1>, scalar_prefetch = 0 : i64, scratch_operands = 1 : i64, tpu.core_type = #tpu.core_type<tc>, window_params = [{transform_indices = @transform_0, window_bounds = array<i64: 16, 128>}, {transform_indices = @transform_1, window_bounds = array<i64: 16, 128>}, {transform_indices = @transform_2, window_bounds = array<i64: 1, 128>}]} {
    %c0_i32 = arith.constant 0 : i32
    %0 = arith.cmpi eq, %arg1, %c0_i32 : i32
    %1 = arith.extui %0 : i1 to i32
    %c0_i32_0 = arith.constant 0 : i32
    %2 = arith.cmpi ne, %1, %c0_i32_0 : i32
    scf.if %2 {
      %cst_16 = arith.constant 0.000000e+00 : f32
      %29 = vector.broadcast %cst_16 : f32 to vector<16x128xf32>
      %c0_17 = arith.constant 0 : index
      %c0_18 = arith.constant 0 : index
      %30 = vector.load %arg5[%c0_17, %c0_18] : memref<16x128xf32, #tpu.memory_space<vmem>>, vector<16x128xf32>
      tpu.vector_store %arg5[%c0_17, %c0_18], %29 {strides = array<i32>} : memref<16x128xf32, #tpu.memory_space<vmem>>, vector<16x128xf32>,
    } else {
    }
    %c0 = arith.constant 0 : index
    %c0_1 = arith.constant 0 : index
    %3 = vector.load %arg2[%c0, %c0_1] : memref<16x128xf32, #tpu.memory_space<vmem>>, vector<16x128xf32>
    %c0_2 = arith.constant 0 : index
    %c0_3 = arith.constant 0 : index
    %4 = vector.load %arg3[%c0_2, %c0_3] : memref<16x128xf32, #tpu.memory_space<vmem>>, vector<16x128xf32>
    %c0_4 = arith.constant 0 : index
    %c0_5 = arith.constant 0 : index
    %5 = vector.load %arg5[%c0_4, %c0_5] : memref<16x128xf32, #tpu.memory_space<vmem>>, vector<16x128xf32>
    %cst = arith.constant 1.000000e+00 : f32
    %6 = vector.broadcast %cst : f32 to vector<16x128xf32>
    %7 = arith.cmpf oeq, %4, %6 : vector<16x128xf32>
    %cst_6 = arith.constant 1.000000e+00 : f32
    %8 = vector.broadcast %cst_6 : f32 to vector<16x128xf32>
    %9 = arith.subf %8, %3 : vector<16x128xf32>
    %10 = arith.select %7, %3, %9 : vector<16x128xi1>, vector<16x128xf32>
    %11 = math.log %10 : vector<16x128xf32>
    %cst_7 = arith.constant -1.000000e+02 : f32
    %12 = vector.broadcast %cst_7 : f32 to vector<16x128xf32>
    %13 = arith.maximumf %11, %12 : vector<16x128xf32>
    %cst_8 = arith.constant 0.000000e+00 : f32
    %14 = vector.broadcast %cst_8 : f32 to vector<16x128xf32>
    %15 = arith.subf %14, %13 : vector<16x128xf32>
    %cst_9 = arith.constant 1.000000e+00 : f32
    %16 = vector.broadcast %cst_9 : f32 to vector<16x128xf32>
    %17 = arith.subf %16, %10 : vector<16x128xf32>
    %cst_10 = arith.constant 7.500000e-01 : f32
    %cst_11 = arith.constant 2.500000e-01 : f32
    %18 = vector.broadcast %cst_10 : f32 to vector<16x128xf32>
    %19 = vector.broadcast %cst_11 : f32 to vector<16x128xf32>
    %20 = arith.select %7, %18, %19 : vector<16x128xi1>, vector<16x128xf32>
    %21 = arith.mulf %17, %17 : vector<16x128xf32>
    %22 = arith.mulf %20, %21 : vector<16x128xf32>
    %23 = arith.mulf %22, %15 : vector<16x128xf32>
    %24 = arith.addf %5, %23 : vector<16x128xf32>
    %c0_12 = arith.constant 0 : index
    %c0_13 = arith.constant 0 : index
    %25 = vector.load %arg5[%c0_12, %c0_13] : memref<16x128xf32, #tpu.memory_space<vmem>>, vector<16x128xf32>
    tpu.vector_store %arg5[%c0_12, %c0_13], %24 {strides = array<i32>} : memref<16x128xf32, #tpu.memory_space<vmem>>, vector<16x128xf32>,
    %c0_i32_14 = arith.constant 0 : i32
    %26 = arith.cmpi eq, %arg1, %c0_i32_14 : i32
    %27 = arith.extui %26 : i1 to i32
    %c0_i32_15 = arith.constant 0 : i32
    %28 = arith.cmpi ne, %27, %c0_i32_15 : i32
    scf.if %28 {
      %c0_16 = arith.constant 0 : index
      %c0_17 = arith.constant 0 : index
      %29 = vector.load %arg5[%c0_16, %c0_17] : memref<16x128xf32, #tpu.memory_space<vmem>>, vector<16x128xf32>
      %cst_18 = arith.constant dense<0.000000e+00> : vector<128xf32>
      %30 = vector.multi_reduction <add>, %29, %cst_18 [0] : vector<16x128xf32> to vector<128xf32>
      %31 = vector.shape_cast %30 : vector<128xf32> to vector<1x128xf32>
      %c0_19 = arith.constant 0 : index
      %c0_20 = arith.constant 0 : index
      %32 = vector.load %arg4[%c0_19, %c0_20] : memref<1x128xf32, #tpu.memory_space<vmem>>, vector<1x128xf32>
      tpu.vector_store %arg4[%c0_19, %c0_20], %31 {strides = array<i32>} : memref<1x128xf32, #tpu.memory_space<vmem>>, vector<1x128xf32>,
    } else {
    }
    return
  }
  func.func @transform_0(%arg0: i32, %arg1: i32) -> (i32, i32) {
    %c1_i32 = arith.constant 1 : i32
    %0 = arith.muli %arg0, %c1_i32 : i32
    %1 = arith.addi %0, %arg1 : i32
    %c0_i32 = arith.constant 0 : i32
    %c0_i32_0 = arith.constant 0 : i32
    return %1, %c0_i32 : i32, i32
  }
  func.func @transform_1(%arg0: i32, %arg1: i32) -> (i32, i32) {
    %c1_i32 = arith.constant 1 : i32
    %0 = arith.muli %arg0, %c1_i32 : i32
    %1 = arith.addi %0, %arg1 : i32
    %c0_i32 = arith.constant 0 : i32
    %c0_i32_0 = arith.constant 0 : i32
    return %1, %c0_i32 : i32, i32
  }
  func.func @transform_2(%arg0: i32, %arg1: i32) -> (i32, i32) {
    %c0_i32 = arith.constant 0 : i32
    %c0_i32_0 = arith.constant 0 : i32
    return %arg0, %c0_i32 : i32, i32
  }
}

</mosaic_0001>

<bundles_post_ra>
// kernel: tpu_custom_call.1
= control target key start
LH: loop header
LB: loop body
LE: loop exit
PB: predicated region body
PF: predicated region fallthrough
CT: control target
= control target key end

     0   :  { %7 = vsyncpa [#allocation4], 0  ;;  %s260_s0 = inlined_call_operand.hbm [shape: f32[16,128], index: 0, kind: input, shape index: {}]   ;;  %s261_s1 = inlined_call_operand.hbm [shape: f32[16,128], index: 1, kind: input, shape index: {}]   ;;  %s262_s2 = inlined_call_operand.hbm [shape: f32[1,128], index: 2, kind: output, shape index: {}]  }
   0x1   :  { %8 = vsyncpa [#allocation7], 0 }
   0x2   :  { %9 = vsyncpa [#allocation5], 0  ;;  %s203_s9 = smov [#allocation3]   ;;  %s131_s13 = scalar_lea.hbm %s260_s0, 256 }
   0x3   :  { %s19_s10 = sshll.u32 %s203_s9, 4  ;;  %p132_p0 = scmp.ne.s32.totalorder %s260_s0, %s131_s13  ;;  %s20_s10 = int_to_ptr.vmem [resolvable:$true] %s19_s10 }
   0x4   :  { %p135_p1 = scmp.lt.u32.totalorder %s131_s13, %s260_s0 }
   0x6   :  { %p137_p2 = pnand %p135_p1, %p132_p0 }
   0x8   :  { %140 = shalt.err (!%p137_p2)
}
   0x9   :  { %s141_s18 = scalar_lea.vmem %s20_s10, 256  ;;  %p146_p4 = scmp.lt.s32.totalorder %s20_s10, %s20_s10 }
   0xa   :  { %p142_p3 = scmp.ne.s32.totalorder %s20_s10, %s141_s18  ;;  %p147_p5 = scmp.lt.s32.totalorder %s141_s18, %s141_s18 }
   0xc   :  { %p148_p6 = por %p147_p5, %p146_p4 }
   0xe   :  { %p149_p7 = pnand %p148_p6, %p142_p3 }
  0x10   :  { %152 = shalt.err (!%p149_p7)
}
  0x11   :  { %s204_s19 = smov 128   ;;  %s205_s20 = smov 8  }
  0x12   :  { %25 = dma.hbm_to_vmem [thread:$0]  %s260_s0, 256, %s20_s10, [#allocation4], %s204_s19, %s204_s19, %s205_s20  }
  0x13   :  { %s206_s23 = smov [#allocation6]   ;;  %s153_s27 = scalar_lea.hbm %s261_s1, 256 }
  0x14   :  { %s35_s24 = sshll.u32 %s206_s23, 4  ;;  %p154_p8 = scmp.ne.s32.totalorder %s261_s1, %s153_s27  ;;  %s36_s24 = int_to_ptr.vmem [resolvable:$true] %s35_s24 }
  0x15   :  { %p157_p9 = scmp.lt.u32.totalorder %s153_s27, %s261_s1 }
  0x17   :  { %p159_p10 = pnand %p157_p9, %p154_p8 }
  0x19   :  { %162 = shalt.err (!%p159_p10)
}
  0x1a   :  { %s163_s4 = scalar_lea.vmem %s36_s24, 256  ;;  %p168_p12 = scmp.lt.s32.totalorder %s36_s24, %s36_s24 }
  0x1b   :  { %p164_p11 = scmp.ne.s32.totalorder %s36_s24, %s163_s4  ;;  %p169_p13 = scmp.lt.s32.totalorder %s163_s4, %s163_s4 }
  0x1d   :  { %p170_p0 = por %p169_p13, %p168_p12 }
  0x1f   :  { %p171_p1 = pnand %p170_p0, %p164_p11 }
  0x21   :  { %174 = shalt.err (!%p171_p1)
}
  0x22   :  { %41 = dma.hbm_to_vmem [thread:$0]  %s261_s1, 256, %s36_s24, [#allocation7], %s204_s19, %s204_s19, %s205_s20  }
  0x23   :  { %197 = dma.done.wait [#allocation4], 256  }
  0x24   :  { %198 = vsyncadd [#allocation4], 4294967040 }
  0x25   :  { %199 = dma.done.wait [#allocation7], 256  }
  0x26   :  { %200 = vsyncadd [#allocation7], 4294967040  ;;  %v58_v0 = vld [vmem:[#allocation3] sm:$0xff]  ;;  %v59_v1 = vld [vmem:[#allocation3 + $0x8] sm:$0xff]  ;;  %v207_v12 = vmov 0.25   ;;  %s208_s1 = smov [#allocation8]  }
  0x27   :  { %v60_v2 = vld [vmem:[#allocation6] sm:$0xff]  ;;  %v61_v3 = vld [vmem:[#allocation6 + $0x8] sm:$0xff]  ;;  %v66_v4 = vsub.f32 1.0, %v58_v0  ;;  %v67_v5 = vsub.f32 1.0, %v59_v1  ;;  %s111_s6 = sshll.u32 %s208_s1, 4  ;;  %s112_s6 = int_to_ptr.vmem [resolvable:$true] %s111_s6 }
  0x28   :  { %vm64_vm0 = vcmp.eq.f32.partialorder %v60_v2, 1.0  ;;  %vm65_vm1 = vcmp.eq.f32.partialorder %v61_v3, 1.0  ;;  %s175_s7 = scalar_lea.vmem %s112_s6, 16  ;;  %s179_s8 = scalar_lea.vmem %s112_s6, 32 }
  0x29   :  { %v68_v6 = vsel %vm64_vm0, %v58_v0, %v66_v4  ;;  %v69_v7 = vsel %vm65_vm1, %v59_v1, %v67_v5  ;;  %v80_v13 = vsel %vm64_vm0, 0.75, %v207_v12  ;;  %v81_v17 = vsel %vm65_vm1, 0.75, %v207_v12  ;;  %p176_p2 = scmp.ne.s32.totalorder %s112_s6, %s175_s7  ;;  %p180_p3 = scmp.lt.s32.totalorder %s112_s6, %s112_s6 }
  0x2a   :  { %127 = vlog2.f32 %v68_v6  ;;  %v78_v8 = vsub.f32 1.0, %v68_v6  ;;  %v79_v9 = vsub.f32 1.0, %v69_v7  ;;  %p181_p4 = scmp.lt.s32.totalorder %s179_s8, %s175_s7 }
  0x2b   :  { %129 = vlog2.f32 %v69_v7 }
  0x2c   :  { %v82_v10 = vmul.f32 %v78_v8, %v78_v8  ;;  %v83_v14 = vmul.f32 %v79_v9, %v79_v9  ;;  %p182_p5 = por %p181_p4, %p180_p3 }
  0x2e   :  { %v84_v20 = vmul.f32 %v82_v10, %v80_v13  ;;  %v85_v22 = vmul.f32 %v83_v14, %v81_v17  ;;  %p183_p6 = pnand %p182_p5, %p176_p2 }
  0x34   :  { %v128_v11 = vpop.eup %127 }
  0x35   :  { %v130_v15 = vpop.eup %129  ;;  %v71_v16 = vmul.f32 0.6931472, %v128_v11 }
  0x36   :  { %v73_v18 = vmul.f32 0.6931472, %v130_v15 }
  0x37   :  { %v74_v19 = vmax.f32 %v71_v16, -100.0 }
  0x38   :  { %v75_v21 = vmax.f32 %v73_v18, -100.0 }
  0x39   :  { %v76_v23 = vsub.f32 0.0, %v74_v19 }
  0x3a   :  { %v77_v24 = vsub.f32 0.0, %v75_v21 }
  0x3b   :  { %v86_v25 = vmul.f32 %v84_v20, %v76_v23 }
  0x3c   :  { %v87_v26 = vmul.f32 %v85_v22, %v77_v24 }
  0x3e   :  { %v97_v27 = vadd.f32 %v87_v26, %v86_v25 }
  0x40   :  { %v98_v28 = vrot.slane %v97_v27, 4 }
  0x42   :  { %v99_v29 = vadd.f32 %v98_v28, %v97_v27 }
  0x44   :  { %v100_v30 = vrot.slane %v99_v29, 2 }
  0x46   :  { %v101_v31 = vadd.f32 %v100_v30, %v99_v29 }
  0x48   :  { %v102_v32 = vrot.slane %v101_v31, 1 }
  0x4a   :  { %v103_v33 = vadd.f32 %v102_v32, %v101_v31 }
  0x4c   :  { %104 = vst [vmem:[#allocation8] sm:$0x1] %v103_v33 }
  0x4d   :  { %186 = shalt.err (!%p183_p6)
}
  0x4e   :  { %s187_s11 = scalar_lea.hbm %s262_s2, 16 }
  0x4f   :  { %p188_p7 = scmp.ne.s32.totalorder %s262_s2, %s187_s11  ;;  %p191_p8 = scmp.lt.u32.totalorder %s187_s11, %s262_s2 }
  0x51   :  { %p193_p9 = pnand %p191_p8, %p188_p7 }
  0x53   :  { %196 = shalt.err (!%p193_p9)
}
  0x54   :  { %114 = dma.vmem_to_hbm [thread:$0]  %s112_s6, 16, %s262_s2, [#allocation5]  }
  0x55   :  { %201 = dma.done.wait [#allocation5], 16  }
  0x56   :  { %202 = vsyncadd [#allocation5], 4294967280 }
  0x57   :  { %118 = vsyncpa [#allocation4], 1 }
  0x58   :  { %119 = vsyncpa [#allocation7], 1 }
  0x59   :  { %120 = vsyncpa [#allocation5], 1 }

</bundles_post_ra>
